<compile_context>
chip_gen: v7x
topology: tpu7x:2x2x1
jax: 0.10.0
libtpu: 0.0.40
codegen_flags: <defaults>
</compile_context>

<pallas_src>
import functools
import math

import jax
import jax.numpy as jnp
from jax.experimental import pallas as pl
from jax.experimental.pallas import tpu as pltpu

_LANE = 128
_SUBLANE = 8
_MiB = 1024 * 1024


def _round_up(v, m):
    return (v + m - 1) // m * m


def _physical_vmem_bytes():
    try:
        info = pltpu.get_tpu_info()
        vmem = getattr(info, "vmem_capacity_bytes", None)
        if vmem:
            return int(vmem)
    except Exception:
        pass
    # Conservative default = v7x per-TensorCore VMEM.
    return 64 * _MiB


def _apply_activation(y, activation):
    if activation == "relu":
        return jnp.maximum(y, 0.0)
    elif activation == "tanh":
        return jnp.tanh(y)
    elif activation == "sigmoid":
        return jax.nn.sigmoid(y)
    elif activation == "elu":
        # Clamp the exp argument so the unselected branch never produces inf.
        return jnp.where(y > 0, y, jnp.expm1(jnp.minimum(y, 0.0)))
    elif activation == "softplus":
        return jax.nn.softplus(y)
    elif activation == "identity":
        return y
    else:
        raise NotImplementedError(activation)


def _mlp_fused_kernel(*refs, activations, compute_dtype):
    # refs = (x_ref, w0_ref, b0_ref, w1_ref, b1_ref, ..., o_ref)
    #   x_ref : (tm, K0_pad)                lane-dense activation tile
    #   wL    : (KL_pad, NL_pad)            pre-transposed, resident
    #   bL    : (1, NL_pad) float32         resident
    #   o_ref : (tm, N_last_pad)
    n_layers = len(activations)
    x_ref = refs[0]
    o_ref = refs[-1]

    h = x_ref[...]
    for l in range(n_layers):
        w = refs[1 + 2 * l][...]
        b = refs[2 + 2 * l][...]
        # f32 accumulation on the MXU; operands stay in their native dtype.
        y = jnp.dot(h, w, preferred_element_type=jnp.float32)
        y = _apply_activation(y + b, activations[l])
        # Feed the next matmul in the compute dtype; keep the last layer f32
        # until the final store cast.
        h = y if l == n_layers - 1 else y.astype(compute_dtype)

    o_ref[...] = h.astype(o_ref.dtype)


def _linear_act_kernel(x_ref, w_ref, b_ref, o_ref, acc_ref, *, activation):
    # Streaming fallback: one Linear+activation, (M, N, K) grid, f32 acc.
    @pl.when(pl.program_id(2) == 0)
    def _():
        acc_ref[...] = jnp.zeros_like(acc_ref)

    acc_ref[...] += jnp.dot(x_ref[...], w_ref[...],
                            preferred_element_type=jnp.float32)

    @pl.when(pl.program_id(2) == pl.num_programs(2) - 1)
    def _():
        y = _apply_activation(acc_ref[...] + b_ref[...], activation)
        o_ref[...] = y.astype(o_ref.dtype)


def _make_spec(shape, index_map, pipeline_mode=None):
    if pipeline_mode is None:
        return pl.BlockSpec(shape, index_map)
    return pl.BlockSpec(shape, index_map, pipeline_mode=pipeline_mode)


def mlp_forward(x, params, activation="relu", last_activation=None,
                compute_dtype=None, force_stream=False):
    """Fused MLP forward: y = act_n(...act_1(x @ W1.T + b1)... @ Wn.T + bn)."""
    if last_activation is None:
        last_activation = activation
    n_layers = len(params)
    activations = tuple(
        activation if l < n_layers - 1 else last_activation for l in range(n_layers)
    )

    out_dtype = x.dtype
    cdt = jnp.dtype(compute_dtype) if compute_dtype is not None else jnp.dtype(x.dtype)
    itemsize = cdt.itemsize
    pack = max(_SUBLANE, 32 // itemsize)  # sublane packing: 8 f32 / 16 bf16 / 32 i8

    M, K0 = x.shape
    out_features = params[-1][0].shape[0]

    # ---- pad & pre-transpose weights to lane-dense (K_pad, N_pad) layout ----
    K0_pad = _round_up(K0, _LANE)
    ws, bs, n_pads = [], [], []
    in_pad = K0_pad
    for (w, b) in params:  # w: (out, in)  PyTorch convention
        n, k = w.shape
        n_pad = _round_up(n, _LANE)
        wt = jnp.pad(jnp.transpose(w.astype(cdt)), ((0, in_pad - k), (0, n_pad - n)))
        bp = jnp.pad(b.astype(jnp.float32), (0, n_pad - n)).reshape(1, n_pad)
        ws.append(wt)
        bs.append(bp)
        n_pads.append(n_pad)
        in_pad = n_pad
    N_last_pad = in_pad
    max_dim = max([K0_pad] + n_pads)

    weight_bytes = sum(int(a.size) * jnp.dtype(a.dtype).itemsize for a in ws + bs)

    def _io_bytes(tm):
        return (tm * K0_pad + tm * N_last_pad) * itemsize

    def _work_bytes(tm):
        return 3 * tm * max_dim * 4  # f32 intermediates, conservative

    def _need(tm, weight_mult=1):
        return weight_mult * weight_bytes + 2 * _io_bytes(tm) + _work_bytes(tm)

    phys_vmem = _physical_vmem_bytes()
    cap = int(phys_vmem * 0.85)  # leave headroom for compiler-internal scratch

    # ---- batch tiling (grid over M, "parallel" for megacore) ----
    M_al = _round_up(M, pack)
    if M_al >= 128:
        cands = [t for t in (512, 256, 128) if _need(t, 1) <= cap] or [128]
        # Least padding waste first, then largest tile.
        tm = min(cands, key=lambda t: (_round_up(M_al, t), -t))
    else:
        tm = M_al
    # Guarantee >= 2 grid steps when the batch allows it (keeps both v7x TCs busy).
    if _round_up(M_al, tm) == tm and M_al >= 2 * pack:
        tm = _round_up(-(-M_al // 2), pack)
    M_pad = _round_up(M_al, tm)

    x_p = jnp.pad(x.astype(cdt), ((0, M_pad - M), (0, K0_pad - K0)))

    # ---- cost estimate for XLA's scheduler ----
    flops, trans = 0, 0
    k_in = K0
    for (w, _), act in zip(params, activations):
        n = w.shape[0]
        flops += 2 * M * k_in * n
        if act in ("tanh", "sigmoid", "elu", "softplus"):
            trans += M * n
        k_in = n
    bytes_accessed = (int(x.size) * x.dtype.itemsize
                      + sum(int(w.size) * w.dtype.itemsize + int(b.size) * b.dtype.itemsize
                            for (w, b) in params)
                      + M * out_features * jnp.dtype(out_dtype).itemsize)
    cost = pl.CostEstimate(flops=int(flops), transcendentals=int(trans),
                           bytes_accessed=int(bytes_accessed))

    # ---------------- fully-fused, weights-resident path ----------------
    def run_resident(single_buffer):
        weight_mult = 1 if single_buffer else 2
        vmem_limit = int(min(cap, max(int(_need(tm, weight_mult) * 1.25), 32 * _MiB)))
        pmode = pl.Buffered(1) if single_buffer else None

        in_specs = [pl.BlockSpec((tm, K0_pad), lambda i: (i, 0))]
        flat_params = []
        for wt, bp in zip(ws, bs):
            in_specs.append(_make_spec(wt.shape, lambda i: (0, 0), pmode))
            in_specs.append(_make_spec(bp.shape, lambda i: (0, 0), pmode))
            flat_params.extend([wt, bp])

        out = pl.pallas_call(
            functools.partial(_mlp_fused_kernel, activations=activations,
                              compute_dtype=cdt),
            out_shape=jax.ShapeDtypeStruct((M_pad, N_last_pad), out_dtype),
            grid=(M_pad // tm,),
            in_specs=in_specs,
            out_specs=pl.BlockSpec((tm, N_last_pad), lambda i: (i, 0)),
            compiler_params=pltpu.CompilerParams(
                dimension_semantics=("parallel",),
                vmem_limit_bytes=vmem_limit,
            ),
            cost_estimate=cost,
        )(x_p, *flat_params)
        return jax.block_until_ready(out)

    # ---------------- per-layer weight-streaming fallback ----------------
    def run_streaming():
        h = x_p
        k_pad = K0_pad
        for l, (wt, bp) in enumerate(zip(ws, bs)):
            n_pad = wt.shape[1]
            tn = 256 if n_pad % 256 == 0 else 128
            tk = 512 if k_pad % 512 == 0 else (256 if k_pad % 256 == 0 else 128)
            is_last = (l == len(ws) - 1)
            out_dt = out_dtype if is_last else cdt
            need_s = 2 * (tm * tk + tk * tn + tn + tm * tn) * itemsize + tm * tn * 4
            vmem_limit_s = int(min(cap, max(int(need_s * 1.5), 32 * _MiB)))
            h = pl.pallas_call(
                functools.partial(_linear_act_kernel, activation=activations[l]),
                out_shape=jax.ShapeDtypeStruct((M_pad, n_pad), out_dt),
                grid=(M_pad // tm, n_pad // tn, k_pad // tk),
                in_specs=[pl.BlockSpec((tm, tk), lambda i, j, k: (i, k)),
                          pl.BlockSpec((tk, tn), lambda i, j, k: (k, j)),
                          pl.BlockSpec((1, tn), lambda i, j, k: (0, j))],
                out_specs=pl.BlockSpec((tm, tn), lambda i, j, k: (i, j)),
                scratch_shapes=[pltpu.VMEM((tm, tn), jnp.float32)],
                compiler_params=pltpu.CompilerParams(
                    dimension_semantics=("parallel", "parallel", "arbitrary"),
                    vmem_limit_bytes=vmem_limit_s,
                ),
            )(h, wt, bp)
            k_pad = n_pad
        return jax.block_until_ready(h)

    out_p = None
    if (not force_stream) and _need(tm, 1) <= cap:
        try:
            out_p = run_resident(single_buffer=True)
        except Exception:
            out_p = None
        if out_p is None and _need(tm, 2) <= cap:
            try:
                out_p = run_resident(single_buffer=False)
            except Exception:
                out_p = None
    if out_p is None:
        out_p = run_streaming()

    # strip batch / feature padding
    return out_p[:M, :out_features]


def init_mlp_params(key, in_size, hidden_sizes):
    """Deterministic PyTorch-style (uniform +/- 1/sqrt(fan_in)) Linear init."""
    params = []
    fan_in = in_size
    for hid in hidden_sizes:
        key, kw, kb = jax.random.split(key, 3)
        bound = 1.0 / math.sqrt(fan_in)
        w = jax.random.uniform(kw, (hid, fan_in), jnp.float32, -bound, bound)
        b = jax.random.uniform(kb, (hid,), jnp.float32, -bound, bound)
        params.append((w, b))
        fan_in = hid
    return params


def _reference(x, params):
    ref = x
    for (w, b) in params:
        ref = jnp.maximum(ref @ w.T + b, 0.0)
    return ref


if __name__ == "__main__":
    key = jax.random.PRNGKey(0)
    kx, kx2, kp = jax.random.split(key, 3)

    batch = 8
    in_size = 32
    hidden_sizes = [64, 32]

    x = jax.random.normal(kx, (batch, in_size), jnp.float32)
    params = init_mlp_params(kp, in_size, hidden_sizes)
    ref = _reference(x, params)

    # 1) fused, weights-resident path (small batch)
    out = jax.block_until_ready(mlp_forward(x, params, activation="relu"))
    assert out.shape == (batch, hidden_sizes[-1])
    assert jnp.allclose(out, ref, atol=1e-4, rtol=1e-4)

    # 2) larger batch exercising the multi-step "parallel" grid / tile chooser
    x2 = jax.random.normal(kx2, (384, in_size), jnp.float32)
    ref2 = _reference(x2, params)
    out2 = jax.block_until_ready(mlp_forward(x2, params, activation="relu"))
    assert out2.shape == (384, hidden_sizes[-1])
    assert jnp.allclose(out2, ref2, atol=1e-4, rtol=1e-4)

    # 3) weight-streaming fallback path (forced, same numerics)
    out_s = jax.block_until_ready(
        mlp_forward(x, params, activation="relu", force_stream=True))
    assert jnp.allclose(out_s, ref, atol=1e-4, rtol=1e-4)

    # 4) opt-in bf16 operand path (f32 MXU accumulation retained)
    out_bf = jax.block_until_ready(
        mlp_forward(x, params, activation="relu", compute_dtype=jnp.bfloat16))
    assert out_bf.shape == (batch, hidden_sizes[-1])
    assert jnp.allclose(out_bf, ref, atol=1e-1, rtol=1e-1)

    print("KERNEL_OK")
</pallas_src>

<mosaic_0001>
module attributes {stable_mosaic.version = 11 : i64} {
  func.func @_mlp_fused_kernel(%arg0: i32, %arg1: memref<8x128xf32, #tpu.memory_space<vmem>>, %arg2: memref<128x128xf32, #tpu.memory_space<vmem>>, %arg3: memref<1x128xf32, #tpu.memory_space<vmem>>, %arg4: memref<128x128xf32, #tpu.memory_space<vmem>>, %arg5: memref<1x128xf32, #tpu.memory_space<vmem>>, %arg6: memref<8x128xf32, #tpu.memory_space<vmem>>) attributes {dimension_semantics = [#tpu.dimension_semantics<parallel>], iteration_bounds = array<i64: 1>, scalar_prefetch = 0 : i64, scratch_operands = 0 : i64, tpu.core_type = #tpu.core_type<tc>, window_params = [{transform_indices = @transform_0, window_bounds = array<i64: 8, 128>}, {pipeline_mode = #tpu.pipeline_mode<synchronous>, transform_indices = @transform_1, window_bounds = array<i64: 128, 128>}, {pipeline_mode = #tpu.pipeline_mode<synchronous>, transform_indices = @transform_2, window_bounds = array<i64: 1, 128>}, {pipeline_mode = #tpu.pipeline_mode<synchronous>, transform_indices = @transform_3, window_bounds = array<i64: 128, 128>}, {pipeline_mode = #tpu.pipeline_mode<synchronous>, transform_indices = @transform_4, window_bounds = array<i64: 1, 128>}, {transform_indices = @transform_5, window_bounds = array<i64: 8, 128>}]} {
    %c0 = arith.constant 0 : index
    %c0_0 = arith.constant 0 : index
    %0 = vector.load %arg1[%c0, %c0_0] : memref<8x128xf32, #tpu.memory_space<vmem>>, vector<8x128xf32>
    %c0_1 = arith.constant 0 : index
    %c0_2 = arith.constant 0 : index
    %1 = vector.load %arg2[%c0_1, %c0_2] : memref<128x128xf32, #tpu.memory_space<vmem>>, vector<128x128xf32>
    %c0_3 = arith.constant 0 : index
    %c0_4 = arith.constant 0 : index
    %2 = vector.load %arg3[%c0_3, %c0_4] : memref<1x128xf32, #tpu.memory_space<vmem>>, vector<1x128xf32>
    %cst = arith.constant dense<0.000000e+00> : vector<8x128xf32>
    %3 = tpu.matmul %0, %1, %cst {dimension_numbers = #tpu.dot_dimension_numbers<[1], [0], [0], [1], [0, 0, 1, 1], [], []>} : vector<8x128xf32>, vector<128x128xf32>, vector<8x128xf32> -> vector<8x128xf32>
    %4 = vector.broadcast %2 : vector<1x128xf32> to vector<8x128xf32>
    %5 = arith.addf %3, %4 : vector<8x128xf32>
    %cst_5 = arith.constant 0.000000e+00 : f32
    %6 = vector.broadcast %cst_5 : f32 to vector<8x128xf32>
    %7 = arith.maximumf %5, %6 : vector<8x128xf32>
    %c0_6 = arith.constant 0 : index
    %c0_7 = arith.constant 0 : index
    %8 = vector.load %arg4[%c0_6, %c0_7] : memref<128x128xf32, #tpu.memory_space<vmem>>, vector<128x128xf32>
    %c0_8 = arith.constant 0 : index
    %c0_9 = arith.constant 0 : index
    %9 = vector.load %arg5[%c0_8, %c0_9] : memref<1x128xf32, #tpu.memory_space<vmem>>, vector<1x128xf32>
    %cst_10 = arith.constant dense<0.000000e+00> : vector<8x128xf32>
    %10 = tpu.matmul %7, %8, %cst_10 {dimension_numbers = #tpu.dot_dimension_numbers<[1], [0], [0], [1], [0, 0, 1, 1], [], []>} : vector<8x128xf32>, vector<128x128xf32>, vector<8x128xf32> -> vector<8x128xf32>
    %11 = vector.broadcast %9 : vector<1x128xf32> to vector<8x128xf32>
    %12 = arith.addf %10, %11 : vector<8x128xf32>
    %cst_11 = arith.constant 0.000000e+00 : f32
    %13 = vector.broadcast %cst_11 : f32 to vector<8x128xf32>
    %14 = arith.maximumf %12, %13 : vector<8x128xf32>
    %c0_12 = arith.constant 0 : index
    %c0_13 = arith.constant 0 : index
    %15 = vector.load %arg6[%c0_12, %c0_13] : memref<8x128xf32, #tpu.memory_space<vmem>>, vector<8x128xf32>
    tpu.vector_store %arg6[%c0_12, %c0_13], %14 {strides = array<i32>} : memref<8x128xf32, #tpu.memory_space<vmem>>, vector<8x128xf32>,
    return
  }
  func.func @transform_0(%arg0: i32) -> (i32, i32) {
    %c0_i32 = arith.constant 0 : i32
    %c0_i32_0 = arith.constant 0 : i32
    return %arg0, %c0_i32 : i32, i32
  }
  func.func @transform_1(%arg0: i32) -> (i32, i32) {
    %c0_i32 = arith.constant 0 : i32
    %c0_i32_0 = arith.constant 0 : i32
    %c0_i32_1 = arith.constant 0 : i32
    return %c0_i32, %c0_i32_0 : i32, i32
  }
  func.func @transform_2(%arg0: i32) -> (i32, i32) {
    %c0_i32 = arith.constant 0 : i32
    %c0_i32_0 = arith.constant 0 : i32
    %c0_i32_1 = arith.constant 0 : i32
    return %c0_i32, %c0_i32_0 : i32, i32
  }
  func.func @transform_3(%arg0: i32) -> (i32, i32) {
    %c0_i32 = arith.constant 0 : i32
    %c0_i32_0 = arith.constant 0 : i32
    %c0_i32_1 = arith.constant 0 : i32
    return %c0_i32, %c0_i32_0 : i32, i32
  }
  func.func @transform_4(%arg0: i32) -> (i32, i32) {
    %c0_i32 = arith.constant 0 : i32
    %c0_i32_0 = arith.constant 0 : i32
    %c0_i32_1 = arith.constant 0 : i32
    return %c0_i32, %c0_i32_0 : i32, i32
  }
  func.func @transform_5(%arg0: i32) -> (i32, i32) {
    %c0_i32 = arith.constant 0 : i32
    %c0_i32_0 = arith.constant 0 : i32
    return %arg0, %c0_i32 : i32, i32
  }
}

module attributes {stable_mosaic.version = 11 : i64} {
  func.func @_mlp_fused_kernel(%arg0: i32, %arg1: memref<8x128xf32, #tpu.memory_space<vmem>>, %arg2: memref<128x128xf32, #tpu.memory_space<vmem>>, %arg3: memref<1x128xf32, #tpu.memory_space<vmem>>, %arg4: memref<128x128xf32, #tpu.memory_space<vmem>>, %arg5: memref<1x128xf32, #tpu.memory_space<vmem>>, %arg6: memref<8x128xf32, #tpu.memory_space<vmem>>) attributes {dimension_semantics = [#tpu.dimension_semantics<parallel>], iteration_bounds = array<i64: 1>, scalar_prefetch = 0 : i64, scratch_operands = 0 : i64, tpu.core_type = #tpu.core_type<tc>, window_params = [{transform_indices = @transform_0, window_bounds = array<i64: 8, 128>}, {pipeline_mode = #tpu.pipeline_mode<synchronous>, transform_indices = @transform_1, window_bounds = array<i64: 128, 128>}, {pipeline_mode = #tpu.pipeline_mode<synchronous>, transform_indices = @transform_2, window_bounds = array<i64: 1, 128>}, {pipeline_mode = #tpu.pipeline_mode<synchronous>, transform_indices = @transform_3, window_bounds = array<i64: 128, 128>}, {pipeline_mode = #tpu.pipeline_mode<synchronous>, transform_indices = @transform_4, window_bounds = array<i64: 1, 128>}, {transform_indices = @transform_5, window_bounds = array<i64: 8, 128>}]} {
    %c0 = arith.constant 0 : index
    %c0_0 = arith.constant 0 : index
    %0 = vector.load %arg1[%c0, %c0_0] : memref<8x128xf32, #tpu.memory_space<vmem>>, vector<8x128xf32>
    %c0_1 = arith.constant 0 : index
    %c0_2 = arith.constant 0 : index
    %1 = vector.load %arg2[%c0_1, %c0_2] : memref<128x128xf32, #tpu.memory_space<vmem>>, vector<128x128xf32>
    %c0_3 = arith.constant 0 : index
    %c0_4 = arith.constant 0 : index
    %2 = vector.load %arg3[%c0_3, %c0_4] : memref<1x128xf32, #tpu.memory_space<vmem>>, vector<1x128xf32>
    %cst = arith.constant dense<0.000000e+00> : vector<8x128xf32>
    %3 = tpu.matmul %0, %1, %cst {dimension_numbers = #tpu.dot_dimension_numbers<[1], [0], [0], [1], [0, 0, 1, 1], [], []>} : vector<8x128xf32>, vector<128x128xf32>, vector<8x128xf32> -> vector<8x128xf32>
    %4 = vector.broadcast %2 : vector<1x128xf32> to vector<8x128xf32>
    %5 = arith.addf %3, %4 : vector<8x128xf32>
    %cst_5 = arith.constant 0.000000e+00 : f32
    %6 = vector.broadcast %cst_5 : f32 to vector<8x128xf32>
    %7 = arith.maximumf %5, %6 : vector<8x128xf32>
    %c0_6 = arith.constant 0 : index
    %c0_7 = arith.constant 0 : index
    %8 = vector.load %arg4[%c0_6, %c0_7] : memref<128x128xf32, #tpu.memory_space<vmem>>, vector<128x128xf32>
    %c0_8 = arith.constant 0 : index
    %c0_9 = arith.constant 0 : index
    %9 = vector.load %arg5[%c0_8, %c0_9] : memref<1x128xf32, #tpu.memory_space<vmem>>, vector<1x128xf32>
    %cst_10 = arith.constant dense<0.000000e+00> : vector<8x128xf32>
    %10 = tpu.matmul %7, %8, %cst_10 {dimension_numbers = #tpu.dot_dimension_numbers<[1], [0], [0], [1], [0, 0, 1, 1], [], []>} : vector<8x128xf32>, vector<128x128xf32>, vector<8x128xf32> -> vector<8x128xf32>
    %11 = vector.broadcast %9 : vector<1x128xf32> to vector<8x128xf32>
    %12 = arith.addf %10, %11 : vector<8x128xf32>
    %cst_11 = arith.constant 0.000000e+00 : f32
    %13 = vector.broadcast %cst_11 : f32 to vector<8x128xf32>
    %14 = arith.maximumf %12, %13 : vector<8x128xf32>
    %c0_12 = arith.constant 0 : index
    %c0_13 = arith.constant 0 : index
    %15 = vector.load %arg6[%c0_12, %c0_13] : memref<8x128xf32, #tpu.memory_space<vmem>>, vector<8x128xf32>
    tpu.vector_store %arg6[%c0_12, %c0_13], %14 {strides = array<i32>} : memref<8x128xf32, #tpu.memory_space<vmem>>, vector<8x128xf32>,
    return
  }
  func.func @transform_0(%arg0: i32) -> (i32, i32) {
    %c0_i32 = arith.constant 0 : i32
    %c0_i32_0 = arith.constant 0 : i32
    return %arg0, %c0_i32 : i32, i32
  }
  func.func @transform_1(%arg0: i32) -> (i32, i32) {
    %c0_i32 = arith.constant 0 : i32
    %c0_i32_0 = arith.constant 0 : i32
    %c0_i32_1 = arith.constant 0 : i32
    return %c0_i32, %c0_i32_0 : i32, i32
  }
  func.func @transform_2(%arg0: i32) -> (i32, i32) {
    %c0_i32 = arith.constant 0 : i32
    %c0_i32_0 = arith.constant 0 : i32
    %c0_i32_1 = arith.constant 0 : i32
    return %c0_i32, %c0_i32_0 : i32, i32
  }
  func.func @transform_3(%arg0: i32) -> (i32, i32) {
    %c0_i32 = arith.constant 0 : i32
    %c0_i32_0 = arith.constant 0 : i32
    %c0_i32_1 = arith.constant 0 : i32
    return %c0_i32, %c0_i32_0 : i32, i32
  }
  func.func @transform_4(%arg0: i32) -> (i32, i32) {
    %c0_i32 = arith.constant 0 : i32
    %c0_i32_0 = arith.constant 0 : i32
    %c0_i32_1 = arith.constant 0 : i32
    return %c0_i32, %c0_i32_0 : i32, i32
  }
  func.func @transform_5(%arg0: i32) -> (i32, i32) {
    %c0_i32 = arith.constant 0 : i32
    %c0_i32_0 = arith.constant 0 : i32
    return %arg0, %c0_i32 : i32, i32
  }
}

module attributes {stable_mosaic.version = 11 : i64} {
  func.func @_linear_act_kernel(%arg0: i32, %arg1: i32, %arg2: i32, %arg3: memref<8x128xf32, #tpu.memory_space<vmem>>, %arg4: memref<128x128xf32, #tpu.memory_space<vmem>>, %arg5: memref<1x128xf32, #tpu.memory_space<vmem>>, %arg6: memref<8x128xf32, #tpu.memory_space<vmem>>, %arg7: memref<8x128xf32, #tpu.memory_space<vmem>>) attributes {dimension_semantics = [#tpu.dimension_semantics<parallel>, #tpu.dimension_semantics<parallel>, #tpu.dimension_semantics<arbitrary>], iteration_bounds = array<i64: 1, 1, 1>, scalar_prefetch = 0 : i64, scratch_operands = 1 : i64, tpu.core_type = #tpu.core_type<tc>, window_params = [{transform_indices = @transform_0, window_bounds = array<i64: 8, 128>}, {transform_indices = @transform_1, window_bounds = array<i64: 128, 128>}, {transform_indices = @transform_2, window_bounds = array<i64: 1, 128>}, {transform_indices = @transform_3, window_bounds = array<i64: 8, 128>}]} {
    %c0_i32 = arith.constant 0 : i32
    %0 = arith.cmpi eq, %arg2, %c0_i32 : i32
    %1 = arith.extui %0 : i1 to i32
    %c0_i32_0 = arith.constant 0 : i32
    %2 = arith.cmpi ne, %1, %c0_i32_0 : i32
    scf.if %2 {
      %cst_10 = arith.constant 0.000000e+00 : f32
      %12 = vector.broadcast %cst_10 : f32 to vector<8x128xf32>
      %c0_11 = arith.constant 0 : index
      %c0_12 = arith.constant 0 : index
      %13 = vector.load %arg7[%c0_11, %c0_12] : memref<8x128xf32, #tpu.memory_space<vmem>>, vector<8x128xf32>
      tpu.vector_store %arg7[%c0_11, %c0_12], %12 {strides = array<i32>} : memref<8x128xf32, #tpu.memory_space<vmem>>, vector<8x128xf32>,
    } else {
    }
    %c0 = arith.constant 0 : index
    %c0_1 = arith.constant 0 : index
    %3 = vector.load %arg7[%c0, %c0_1] : memref<8x128xf32, #tpu.memory_space<vmem>>, vector<8x128xf32>
    %c0_2 = arith.constant 0 : index
    %c0_3 = arith.constant 0 : index
    %4 = vector.load %arg3[%c0_2, %c0_3] : memref<8x128xf32, #tpu.memory_space<vmem>>, vector<8x128xf32>
    %c0_4 = arith.constant 0 : index
    %c0_5 = arith.constant 0 : index
    %5 = vector.load %arg4[%c0_4, %c0_5] : memref<128x128xf32, #tpu.memory_space<vmem>>, vector<128x128xf32>
    %cst = arith.constant dense<0.000000e+00> : vector<8x128xf32>
    %6 = tpu.matmul %4, %5, %cst {dimension_numbers = #tpu.dot_dimension_numbers<[1], [0], [0], [1], [0, 0, 1, 1], [], []>} : vector<8x128xf32>, vector<128x128xf32>, vector<8x128xf32> -> vector<8x128xf32>
    %7 = arith.addf %3, %6 : vector<8x128xf32>
    %c0_6 = arith.constant 0 : index
    %c0_7 = arith.constant 0 : index
    %8 = vector.load %arg7[%c0_6, %c0_7] : memref<8x128xf32, #tpu.memory_space<vmem>>, vector<8x128xf32>
    tpu.vector_store %arg7[%c0_6, %c0_7], %7 {strides = array<i32>} : memref<8x128xf32, #tpu.memory_space<vmem>>, vector<8x128xf32>,
    %c0_i32_8 = arith.constant 0 : i32
    %9 = arith.cmpi eq, %arg2, %c0_i32_8 : i32
    %10 = arith.extui %9 : i1 to i32
    %c0_i32_9 = arith.constant 0 : i32
    %11 = arith.cmpi ne, %10, %c0_i32_9 : i32
    scf.if %11 {
      %c0_10 = arith.constant 0 : index
      %c0_11 = arith.constant 0 : index
      %12 = vector.load %arg7[%c0_10, %c0_11] : memref<8x128xf32, #tpu.memory_space<vmem>>, vector<8x128xf32>
      %c0_12 = arith.constant 0 : index
      %c0_13 = arith.constant 0 : index
      %13 = vector.load %arg5[%c0_12, %c0_13] : memref<1x128xf32, #tpu.memory_space<vmem>>, vector<1x128xf32>
      %14 = vector.broadcast %13 : vector<1x128xf32> to vector<8x128xf32>
      %15 = arith.addf %12, %14 : vector<8x128xf32>
      %cst_14 = arith.constant 0.000000e+00 : f32
      %16 = vector.broadcast %cst_14 : f32 to vector<8x128xf32>
      %17 = arith.maximumf %15, %16 : vector<8x128xf32>
      %c0_15 = arith.constant 0 : index
      %c0_16 = arith.constant 0 : index
      %18 = vector.load %arg6[%c0_15, %c0_16] : memref<8x128xf32, #tpu.memory_space<vmem>>, vector<8x128xf32>
      tpu.vector_store %arg6[%c0_15, %c0_16], %17 {strides = array<i32>} : memref<8x128xf32, #tpu.memory_space<vmem>>, vector<8x128xf32>,
    } else {
    }
    return
  }
  func.func @transform_0(%arg0: i32, %arg1: i32, %arg2: i32) -> (i32, i32) {
    %c0_i32 = arith.constant 0 : i32
    return %arg0, %arg2 : i32, i32
  }
  func.func @transform_1(%arg0: i32, %arg1: i32, %arg2: i32) -> (i32, i32) {
    %c0_i32 = arith.constant 0 : i32
    return %arg2, %arg1 : i32, i32
  }
  func.func @transform_2(%arg0: i32, %arg1: i32, %arg2: i32) -> (i32, i32) {
    %c0_i32 = arith.constant 0 : i32
    %c0_i32_0 = arith.constant 0 : i32
    return %c0_i32, %arg1 : i32, i32
  }
  func.func @transform_3(%arg0: i32, %arg1: i32, %arg2: i32) -> (i32, i32) {
    %c0_i32 = arith.constant 0 : i32
    return %arg0, %arg1 : i32, i32
  }
}

</mosaic_0001>

<bundles_post_ra>
// kernel: tpu_custom_call.1
= control target key start
LH: loop header
LB: loop body
LE: loop exit
PB: predicated region body
PF: predicated region fallthrough
CT: control target
= control target key end

     0   :  { %10 = vsyncpa [#allocation3], 0  ;;  %s638_s0 = inlined_call_operand.hbm [shape: f32[8,128], index: 0, kind: input, shape index: {}]   ;;  %s639_s1 = inlined_call_operand.hbm [shape: f32[128,128], index: 1, kind: input, shape index: {}]   ;;  %s640_s2 = inlined_call_operand.vmem [shape: f32[1,128], index: 2, kind: input, shape index: {}]   ;;  %s641_s3 = inlined_call_operand.hbm [shape: f32[128,128], index: 3, kind: input, shape index: {}]   ;;  %s642_s4 = inlined_call_operand.vmem [shape: f32[1,128], index: 4, kind: input, shape index: {}]   ;;  %s643_s5 = inlined_call_operand.hbm [shape: f32[8,128], index: 5, kind: output, shape index: {}]  }
   0x1   :  { %11 = vsyncpa [#allocation6], 0 }
   0x2   :  { %12 = vsyncpa [#allocation4], 0  ;;  %s523_s18 = smov [#allocation5]   ;;  %s429_s22 = scalar_lea.hbm %s639_s1, 2048 }
   0x3   :  { %s28_s19 = sshll.u32 %s523_s18, 4  ;;  %p430_p0 = scmp.ne.s32.totalorder %s639_s1, %s429_s22  ;;  %s29_s19 = int_to_ptr.vmem [resolvable:$true] %s28_s19 }
   0x4   :  { %p433_p1 = scmp.lt.u32.totalorder %s429_s22, %s639_s1 }
   0x6   :  { %p435_p2 = pnand %p433_p1, %p430_p0 }
   0x8   :  { %438 = shalt.err (!%p435_p2)
}
   0x9   :  { %s439_s27 = scalar_lea.vmem %s29_s19, 2048  ;;  %p444_p4 = scmp.lt.s32.totalorder %s29_s19, %s29_s19 }
   0xa   :  { %p440_p3 = scmp.ne.s32.totalorder %s29_s19, %s439_s27  ;;  %p445_p5 = scmp.lt.s32.totalorder %s439_s27, %s439_s27 }
   0xc   :  { %p446_p6 = por %p445_p5, %p444_p4 }
   0xe   :  { %p447_p7 = pnand %p446_p6, %p440_p3 }
  0x10   :  { %450 = shalt.err (!%p447_p7)
}
  0x11   :  { %s524_s28 = smov 128   ;;  %s525_s29 = smov 8  }
  0x12   :  { %34 = dma.hbm_to_vmem [thread:$0]  %s639_s1, 2048, %s29_s19, [#allocation6], %s524_s28, %s524_s28, %s525_s29  }
  0x13   :  { %s526_s7 = smov [#allocation2]   ;;  %s527_s9 = smov [#allocation7]  }
  0x14   :  { %s19_s8 = sshll.u32 %s526_s7, 4  ;;  %s42_s10 = sshll.u32 %s527_s9, 4  ;;  %s20_s8 = int_to_ptr.vmem [resolvable:$true] %s19_s8  ;;  %s43_s10 = int_to_ptr.vmem [resolvable:$true] %s42_s10 }
  0x15   :  { %s451_s13 = scalar_lea.hbm %s638_s0, 128 }
  0x16   :  { %p452_p8 = scmp.ne.s32.totalorder %s638_s0, %s451_s13  ;;  %p455_p9 = scmp.lt.u32.totalorder %s451_s13, %s638_s0 }
  0x18   :  { %p457_p10 = pnand %p455_p9, %p452_p8 }
  0x1a   :  { %460 = shalt.err (!%p457_p10)
}
  0x1b   :  { %s461_s1 = scalar_lea.vmem %s20_s8, 128  ;;  %p466_p12 = scmp.lt.s32.totalorder %s20_s8, %s20_s8 }
  0x1c   :  { %p462_p11 = scmp.ne.s32.totalorder %s20_s8, %s461_s1  ;;  %p467_p13 = scmp.lt.s32.totalorder %s461_s1, %s461_s1 }
  0x1e   :  { %p468_p0 = por %p467_p13, %p466_p12 }
  0x20   :  { %p469_p1 = pnand %p468_p0, %p462_p11 }
  0x22   :  { %472 = shalt.err (!%p469_p1)
}
  0x23   :  { %22 = dma.hbm_to_vmem [thread:$0]  %s638_s0, 128, %s20_s8, [#allocation3]  }
  0x24   :  { %s473_s22 = scalar_lea.hbm %s641_s3, 2048 }
  0x25   :  { %p474_p2 = scmp.ne.s32.totalorder %s641_s3, %s473_s22  ;;  %p477_p3 = scmp.lt.u32.totalorder %s473_s22, %s641_s3 }
  0x27   :  { %p479_p4 = pnand %p477_p3, %p474_p2 }
  0x29   :  { %482 = shalt.err (!%p479_p4)
}
  0x2a   :  { %s483_s27 = scalar_lea.vmem %s43_s10, 2048  ;;  %p488_p6 = scmp.lt.s32.totalorder %s43_s10, %s43_s10 }
  0x2b   :  { %p484_p5 = scmp.ne.s32.totalorder %s43_s10, %s483_s27  ;;  %p489_p7 = scmp.lt.s32.totalorder %s483_s27, %s483_s27 }
  0x2d   :  { %p490_p8 = por %p489_p7, %p488_p6 }
  0x2f   :  { %p491_p9 = pnand %p490_p8, %p484_p5 }
  0x31   :  { %494 = shalt.err (!%p491_p9)
}
  0x32   :  { %48 = dma.hbm_to_vmem [thread:$0]  %s641_s3, 2048, %s43_s10, [#allocation6], %s524_s28, %s524_s28, %s525_s29  }
  0x33   :  { %517 = dma.done.wait [#allocation3], 128  }
  0x34   :  { %518 = vsyncadd [#allocation3], 4294967168 }
  0x35   :  { %519 = dma.done.wait [#allocation6], 4096  }
  0x36   :  { %520 = vsyncadd [#allocation6], 4294963200  ;;  %v528_v0 = vmov 0.0|0.0   ;;  %vm529_vm0 = vmmov 0   ;;  %v530_v1 = vmov 0.0   ;;  %v61_v2 = vld [vmem:[#allocation5] sm:$0xff] }
  0x37   :  { %372 = vmatprep.subr.bf16.mxu0 %v528_v0  ;;  %334 = vmatprep.mubr.msk.f32.mxu0 %vm529_vm0, %v530_v1  ;;  %v62_v3 = vld [vmem:[#allocation5 + $0x8] sm:$0xff]  ;;  %v63_v4 = vld [vmem:[#allocation5 + $0x10] sm:$0xff]  ;;  %v64_v6 = vld [vmem:[#allocation5 + $0x18] sm:$0xff]  ;;  %s531_s7 = smov [#allocation8]  }
  0x38   :  { %396 = vmatprep.subr.bf16.mxu1 %v528_v0  ;;  %369 = vmatprep.mubr.msk.f32.mxu1 %vm529_vm0, %v530_v1  ;;  %v373_v5 = vpack.c.bf16 %v62_v3, %v61_v2  ;;  %v376_v7 = vpack.c.bf16 %v64_v6, %v63_v4  ;;  %v65_v8 = vld [vmem:[#allocation5 + $0x20] sm:$0xff]  ;;  %v66_v9 = vld [vmem:[#allocation5 + $0x28] sm:$0xff]  ;;  %v157_v12 = vld [vmem:[#allocation7 + $0x10] sm:$0xff]  ;;  %s256_s8 = sshll.u32 %s531_s7, 4  ;;  %s257_s8 = int_to_ptr.vmem [resolvable:$true] %s256_s8 }
  0x39   :  { %v155_v10 = vld [vmem:[#allocation7] sm:$0xff]  ;;  %v156_v11 = vld [vmem:[#allocation7 + $0x8] sm:$0xff]  ;;  %v158_v13 = vld [vmem:[#allocation7 + $0x18] sm:$0xff]  ;;  %v379_v14 = vpack.c.bf16 %v66_v9, %v65_v8  ;;  %s495_s9 = scalar_lea.vmem %s257_s8, 128  ;;  %p500_p11 = scmp.lt.s32.totalorder %s257_s8, %s257_s8 }
  0x3a   :  { %374 = vmatpush3.bf16.msra.mxu0 %v373_v5  ;;  %v397_v15 = vpack.c.bf16 %v156_v11, %v155_v10  ;;  %v67_v16 = vld [vmem:[#allocation5 + $0x30] sm:$0xff]  ;;  %v68_v17 = vld [vmem:[#allocation5 + $0x38] sm:$0xff]  ;;  %v400_v18 = vpack.c.bf16 %v158_v13, %v157_v12  ;;  %v159_v19 = vld [vmem:[#allocation7 + $0x20] sm:$0xff]  ;;  %p496_p10 = scmp.ne.s32.totalorder %s257_s8, %s495_s9  ;;  %p501_p12 = scmp.lt.s32.totalorder %s495_s9, %s495_s9 }
  0x3b   :  { %375 = vmatprep.subr.bf16.mxu0 %v528_v0  ;;  %v160_v20 = vld [vmem:[#allocation7 + $0x28] sm:$0xff]  ;;  %v382_v21 = vpack.c.bf16 %v68_v17, %v67_v16  ;;  %v69_v22 = vld [vmem:[#allocation5 + $0x40] sm:$0xff]  ;;  %v161_v25 = vld [vmem:[#allocation7 + $0x30] sm:$0xff] }
  0x3c   :  { %398 = vmatpush3.bf16.msra.mxu1 %v397_v15  ;;  %v70_v23 = vld [vmem:[#allocation5 + $0x48] sm:$0xff]  ;;  %v403_v24 = vpack.c.bf16 %v160_v20, %v159_v19  ;;  %v162_v26 = vld [vmem:[#allocation7 + $0x38] sm:$0xff]  ;;  %v71_v28 = vld [vmem:[#allocation5 + $0x50] sm:$0xff]  ;;  %p502_p13 = por %p501_p12, %p500_p11 }
  0x3d   :  { %399 = vmatprep.subr.bf16.mxu1 %v528_v0  ;;  %v385_v27 = vpack.c.bf16 %v70_v23, %v69_v22  ;;  %v72_v29 = vld [vmem:[#allocation5 + $0x58] sm:$0xff]  ;;  %v406_v30 = vpack.c.bf16 %v162_v26, %v161_v25  ;;  %v163_v31 = vld [vmem:[#allocation7 + $0x40] sm:$0xff]  ;;  %v164_v32 = vld [vmem:[#allocation7 + $0x48] sm:$0xff] }
  0x3e   :  { %377 = vmatpush3.bf16.msra.mxu0 %v376_v7  ;;  %v388_v33 = vpack.c.bf16 %v72_v29, %v71_v28  ;;  %v73_v34 = vld [vmem:[#allocation5 + $0x60] sm:$0xff]  ;;  %v74_v35 = vld [vmem:[#allocation5 + $0x68] sm:$0xff]  ;;  %v409_v36 = vpack.c.bf16 %v164_v32, %v163_v31  ;;  %v165_v37 = vld [vmem:[#allocation7 + $0x50] sm:$0xff]  ;;  %p503_p0 = pnand %p502_p13, %p496_p10 }
  0x3f   :  { %378 = vmatprep.subr.bf16.mxu0 %v528_v0  ;;  %v166_v38 = vld [vmem:[#allocation7 + $0x58] sm:$0xff]  ;;  %v391_v39 = vpack.c.bf16 %v74_v35, %v73_v34  ;;  %v75_v40 = vld [vmem:[#allocation5 + $0x70] sm:$0xff]  ;;  %v167_v43 = vld [vmem:[#allocation7 + $0x60] sm:$0xff] }
  0x40   :  { %401 = vmatpush3.bf16.msra.mxu1 %v400_v18  ;;  %v76_v41 = vld [vmem:[#allocation5 + $0x78] sm:$0xff]  ;;  %v412_v42 = vpack.c.bf16 %v166_v38, %v165_v37  ;;  %v168_v44 = vld [vmem:[#allocation7 + $0x68] sm:$0xff]  ;;  %v169_v48 = vld [vmem:[#allocation7 + $0x70] sm:$0xff] }
  0x41   :  { %402 = vmatprep.subr.bf16.mxu1 %v528_v0  ;;  %v394_v45 = vpack.c.bf16 %v76_v41, %v75_v40  ;;  %v415_v46 = vpack.c.bf16 %v168_v44, %v167_v43  ;;  %v60_v47 = vld [vmem:[#allocation2] sm:$0xff] }
  0x42   :  { %380 = vmatpush3.bf16.msra.mxu0 %v379_v14  ;;  %v170_v49 = vld [vmem:[#allocation7 + $0x78] sm:$0xff] }
  0x43   :  { %381 = vmatprep.subr.bf16.mxu0 %v528_v0  ;;  %v418_v50 = vpack.c.bf16 %v170_v49, %v169_v48  ;;  %v266_v51 = vld [vmem:[%s640_s2] ss:$0 sm:$0xff] }
  0x44   :  { %404 = vmatpush3.bf16.msra.mxu1 %v403_v24  ;;  %v267_v56 = vld [vmem:[%s642_s4] ss:$0 sm:$0xff] }
  0x45   :  { %405 = vmatprep.subr.bf16.mxu1 %v528_v0 }
  0x46   :  { %383 = vmatpush3.bf16.msra.mxu0 %v382_v21 }
  0x47   :  { %384 = vmatprep.subr.bf16.mxu0 %v528_v0 }
  0x48   :  { %407 = vmatpush3.bf16.msra.mxu1 %v406_v30 }
  0x49   :  { %408 = vmatprep.subr.bf16.mxu1 %v528_v0 }
  0x4a   :  { %386 = vmatpush3.bf16.msra.mxu0 %v385_v27 }
  0x4b   :  { %387 = vmatprep.subr.bf16.mxu0 %v528_v0 }
  0x4c   :  { %410 = vmatpush3.bf16.msra.mxu1 %v409_v36 }
  0x4d   :  { %411 = vmatprep.subr.bf16.mxu1 %v528_v0 }
  0x4e   :  { %389 = vmatpush3.bf16.msra.mxu0 %v388_v33 }
  0x4f   :  { %390 = vmatprep.subr.bf16.mxu0 %v528_v0 }
  0x50   :  { %413 = vmatpush3.bf16.msra.mxu1 %v412_v42 }
  0x51   :  { %414 = vmatprep.subr.bf16.mxu1 %v528_v0 }
  0x52   :  { %392 = vmatpush3.bf16.msra.mxu0 %v391_v39 }
  0x53   :  { %393 = vmatprep.subr.bf16.mxu0 %v528_v0 }
  0x54   :  { %416 = vmatpush3.bf16.msra.mxu1 %v415_v46 }
  0x55   :  { %417 = vmatprep.subr.bf16.mxu1 %v528_v0 }
  0x56   :  { %395 = vmatpush3.bf16.msra.mxu0 %v394_v45 }
  0x58   :  { %419 = vmatpush3.bf16.msra.mxu1 %v418_v50 }
  0x59   :  { %335 = vmatmul.mubr.f32.vlgmr.msra.gmra.mrb[0].mxu0 %v60_v47 }
 0x12c   :  { %v150_v52 = vpop.f32.mrb[0].mxu0 }
 0x12d   :  { %v151_v53 = vadd.f32 %v266_v51, %v150_v52  ;;  %v336_v54 = vpop.f32.mrb[1].mxu0 }
 0x12f   :  { %v154_v55 = vmax.f32 %v151_v53, 0.0 }
 0x131   :  { %370 = vmatmul.mubr.f32.vlgmr.msra.gmra.mrb[0].mxu1 %v154_v55 }
 0x204   :  { %v244_v57 = vpop.f32.mrb[0].mxu1 }
 0x205   :  { %v245_v58 = vadd.f32 %v267_v56, %v244_v57  ;;  %v371_v59 = vpop.f32.mrb[1].mxu1 }
 0x207   :  { %v248_v60 = vmax.f32 %v245_v58, 0.0 }
 0x209   :  { %249 = vst [vmem:[#allocation8] sm:$0xff] %v248_v60 }
 0x20a   :  { %506 = shalt.err (!%p503_p0)
}
 0x20b   :  { %s507_s11 = scalar_lea.hbm %s643_s5, 128 }
 0x20c   :  { %p508_p1 = scmp.ne.s32.totalorder %s643_s5, %s507_s11  ;;  %p511_p2 = scmp.lt.u32.totalorder %s507_s11, %s643_s5 }
 0x20e   :  { %p513_p3 = pnand %p511_p2, %p508_p1 }
 0x210   :  { %516 = shalt.err (!%p513_p3)
}
 0x211   :  { %259 = dma.vmem_to_hbm [thread:$0]  %s257_s8, 128, %s643_s5, [#allocation4]  }
 0x212   :  { %521 = dma.done.wait [#allocation4], 128  }
 0x213   :  { %522 = vsyncadd [#allocation4], 4294967168 }
 0x214   :  { %263 = vsyncpa [#allocation3], 1 }
 0x215   :  { %264 = vsyncpa [#allocation6], 1 }
 0x216   :  { %265 = vsyncpa [#allocation4], 1 }

// kernel: tpu_custom_call.1
= control target key start
LH: loop header
LB: loop body
LE: loop exit
PB: predicated region body
PF: predicated region fallthrough
CT: control target
= control target key end

     0   :  { %10 = vsyncpa [#allocation3], 0  ;;  %s638_s0 = inlined_call_operand.hbm [shape: f32[8,128], index: 0, kind: input, shape index: {}]   ;;  %s639_s1 = inlined_call_operand.hbm [shape: f32[128,128], index: 1, kind: input, shape index: {}]   ;;  %s640_s2 = inlined_call_operand.vmem [shape: f32[1,128], index: 2, kind: input, shape index: {}]   ;;  %s641_s3 = inlined_call_operand.hbm [shape: f32[128,128], index: 3, kind: input, shape index: {}]   ;;  %s642_s4 = inlined_call_operand.vmem [shape: f32[1,128], index: 4, kind: input, shape index: {}]   ;;  %s643_s5 = inlined_call_operand.hbm [shape: f32[8,128], index: 5, kind: output, shape index: {}]  }
   0x1   :  { %11 = vsyncpa [#allocation6], 0 }
   0x2   :  { %12 = vsyncpa [#allocation4], 0  ;;  %s523_s18 = smov [#allocation5]   ;;  %s429_s22 = scalar_lea.hbm %s639_s1, 2048 }
   0x3   :  { %s28_s19 = sshll.u32 %s523_s18, 4  ;;  %p430_p0 = scmp.ne.s32.totalorder %s639_s1, %s429_s22  ;;  %s29_s19 = int_to_ptr.vmem [resolvable:$true] %s28_s19 }
   0x4   :  { %p433_p1 = scmp.lt.u32.totalorder %s429_s22, %s639_s1 }
   0x6   :  { %p435_p2 = pnand %p433_p1, %p430_p0 }
   0x8   :  { %438 = shalt.err (!%p435_p2)
}
   0x9   :  { %s439_s27 = scalar_lea.vmem %s29_s19, 2048  ;;  %p444_p4 = scmp.lt.s32.totalorder %s29_s19, %s29_s19 }
   0xa   :  { %p440_p3 = scmp.ne.s32.totalorder %s29_s19, %s439_s27  ;;  %p445_p5 = scmp.lt.s32.totalorder %s439_s27, %s439_s27 }
   0xc   :  { %p446_p6 = por %p445_p5, %p444_p4 }
   0xe   :  { %p447_p7 = pnand %p446_p6, %p440_p3 }
  0x10   :  { %450 = shalt.err (!%p447_p7)
}
  0x11   :  { %s524_s28 = smov 128   ;;  %s525_s29 = smov 8  }
  0x12   :  { %34 = dma.hbm_to_vmem [thread:$0]  %s639_s1, 2048, %s29_s19, [#allocation6], %s524_s28, %s524_s28, %s525_s29  }
  0x13   :  { %s526_s7 = smov [#allocation2]   ;;  %s527_s9 = smov [#allocation7]  }
  0x14   :  { %s19_s8 = sshll.u32 %s526_s7, 4  ;;  %s42_s10 = sshll.u32 %s527_s9, 4  ;;  %s20_s8 = int_to_ptr.vmem [resolvable:$true] %s19_s8  ;;  %s43_s10 = int_to_ptr.vmem [resolvable:$true] %s42_s10 }
  0x15   :  { %s451_s13 = scalar_lea.hbm %s638_s0, 128 }
  0x16   :  { %p452_p8 = scmp.ne.s32.totalorder %s638_s0, %s451_s13  ;;  %p455_p9 = scmp.lt.u32.totalorder %s451_s13, %s638_s0 }
  0x18   :  { %p457_p10 = pnand %p455_p9, %p452_p8 }
  0x1a   :  { %460 = shalt.err (!%p457_p10)
}
  0x1b   :  { %s461_s1 = scalar_lea.vmem %s20_s8, 128  ;;  %p466_p12 = scmp.lt.s32.totalorder %s20_s8, %s20_s8 }
  0x1c   :  { %p462_p11 = scmp.ne.s32.totalorder %s20_s8, %s461_s1  ;;  %p467_p13 = scmp.lt.s32.totalorder %s461_s1, %s461_s1 }
  0x1e   :  { %p468_p0 = por %p467_p13, %p466_p12 }
  0x20   :  { %p469_p1 = pnand %p468_p0, %p462_p11 }
  0x22   :  { %472 = shalt.err (!%p469_p1)
}
  0x23   :  { %22 = dma.hbm_to_vmem [thread:$0]  %s638_s0, 128, %s20_s8, [#allocation3]  }
  0x24   :  { %s473_s22 = scalar_lea.hbm %s641_s3, 2048 }
  0x25   :  { %p474_p2 = scmp.ne.s32.totalorder %s641_s3, %s473_s22  ;;  %p477_p3 = scmp.lt.u32.totalorder %s473_s22, %s641_s3 }
  0x27   :  { %p479_p4 = pnand %p477_p3, %p474_p2 }
  0x29   :  { %482 = shalt.err (!%p479_p4)
}
  0x2a   :  { %s483_s27 = scalar_lea.vmem %s43_s10, 2048  ;;  %p488_p6 = scmp.lt.s32.totalorder %s43_s10, %s43_s10 }
  0x2b   :  { %p484_p5 = scmp.ne.s32.totalorder %s43_s10, %s483_s27  ;;  %p489_p7 = scmp.lt.s32.totalorder %s483_s27, %s483_s27 }
  0x2d   :  { %p490_p8 = por %p489_p7, %p488_p6 }
  0x2f   :  { %p491_p9 = pnand %p490_p8, %p484_p5 }
  0x31   :  { %494 = shalt.err (!%p491_p9)
}
  0x32   :  { %48 = dma.hbm_to_vmem [thread:$0]  %s641_s3, 2048, %s43_s10, [#allocation6], %s524_s28, %s524_s28, %s525_s29  }
  0x33   :  { %517 = dma.done.wait [#allocation3], 128  }
  0x34   :  { %518 = vsyncadd [#allocation3], 4294967168 }
  0x35   :  { %519 = dma.done.wait [#allocation6], 4096  }
  0x36   :  { %520 = vsyncadd [#allocation6], 4294963200  ;;  %v528_v0 = vmov 0.0|0.0   ;;  %vm529_vm0 = vmmov 0   ;;  %v530_v1 = vmov 0.0   ;;  %v61_v2 = vld [vmem:[#allocation5] sm:$0xff] }
  0x37   :  { %372 = vmatprep.subr.bf16.mxu0 %v528_v0  ;;  %334 = vmatprep.mubr.msk.f32.mxu0 %vm529_vm0, %v530_v1  ;;  %v62_v3 = vld [vmem:[#allocation5 + $0x8] sm:$0xff]  ;;  %v63_v4 = vld [vmem:[#allocation5 + $0x10] sm:$0xff]  ;;  %v64_v6 = vld [vmem:[#allocation5 + $0x18] sm:$0xff]  ;;  %s531_s7 = smov [#allocation8]  }
  0x38   :  { %396 = vmatprep.subr.bf16.mxu1 %v528_v0  ;;  %369 = vmatprep.mubr.msk.f32.mxu1 %vm529_vm0, %v530_v1  ;;  %v373_v5 = vpack.c.bf16 %v62_v3, %v61_v2  ;;  %v376_v7 = vpack.c.bf16 %v64_v6, %v63_v4  ;;  %v65_v8 = vld [vmem:[#allocation5 + $0x20] sm:$0xff]  ;;  %v66_v9 = vld [vmem:[#allocation5 + $0x28] sm:$0xff]  ;;  %v157_v12 = vld [vmem:[#allocation7 + $0x10] sm:$0xff]  ;;  %s256_s8 = sshll.u32 %s531_s7, 4  ;;  %s257_s8 = int_to_ptr.vmem [resolvable:$true] %s256_s8 }
  0x39   :  { %v155_v10 = vld [vmem:[#allocation7] sm:$0xff]  ;;  %v156_v11 = vld [vmem:[#allocation7 + $0x8] sm:$0xff]  ;;  %v158_v13 = vld [vmem:[#allocation7 + $0x18] sm:$0xff]  ;;  %v379_v14 = vpack.c.bf16 %v66_v9, %v65_v8  ;;  %s495_s9 = scalar_lea.vmem %s257_s8, 128  ;;  %p500_p11 = scmp.lt.s32.totalorder %s257_s8, %s257_s8 }
  0x3a   :  { %374 = vmatpush3.bf16.msra.mxu0 %v373_v5  ;;  %v397_v15 = vpack.c.bf16 %v156_v11, %v155_v10  ;;  %v67_v16 = vld [vmem:[#allocation5 + $0x30] sm:$0xff]  ;;  %v68_v17 = vld [vmem:[#allocation5 + $0x38] sm:$0xff]  ;;  %v400_v18 = vpack.c.bf16 %v158_v13, %v157_v12  ;;  %v159_v19 = vld [vmem:[#allocation7 + $0x20] sm:$0xff]  ;;  %p496_p10 = scmp.ne.s32.totalorder %s257_s8, %s495_s9  ;;  %p501_p12 = scmp.lt.s32.totalorder %s495_s9, %s495_s9 }
  0x3b   :  { %375 = vmatprep.subr.bf16.mxu0 %v528_v0  ;;  %v160_v20 = vld [vmem:[#allocation7 + $0x28] sm:$0xff]  ;;  %v382_v21 = vpack.c.bf16 %v68_v17, %v67_v16  ;;  %v69_v22 = vld [vmem:[#allocation5 + $0x40] sm:$0xff]  ;;  %v161_v25 = vld [vmem:[#allocation7 + $0x30] sm:$0xff] }
  0x3c   :  { %398 = vmatpush3.bf16.msra.mxu1 %v397_v15  ;;  %v70_v23 = vld [vmem:[#allocation5 + $0x48] sm:$0xff]  ;;  %v403_v24 = vpack.c.bf16 %v160_v20, %v159_v19  ;;  %v162_v26 = vld [vmem:[#allocation7 + $0x38] sm:$0xff]  ;;  %v71_v28 = vld [vmem:[#allocation5 + $0x50] sm:$0xff]  ;;  %p502_p13 = por %p501_p12, %p500_p11 }
  0x3d   :  { %399 = vmatprep.subr.bf16.mxu1 %v528_v0  ;;  %v385_v27 = vpack.c.bf16 %v70_v23, %v69_v22  ;;  %v72_v29 = vld [vmem:[#allocation5 + $0x58] sm:$0xff]  ;;  %v406_v30 = vpack.c.bf16 %v162_v26, %v161_v25  ;;  %v163_v31 = vld [vmem:[#allocation7 + $0x40] sm:$0xff]  ;;  %v164_v32 = vld [vmem:[#allocation7 + $0x48] sm:$0xff] }
  0x3e   :  { %377 = vmatpush3.bf16.msra.mxu0 %v376_v7  ;;  %v388_v33 = vpack.c.bf16 %v72_v29, %v71_v28  ;;  %v73_v34 = vld [vmem:[#allocation5 + $0x60] sm:$0xff]  ;;  %v74_v35 = vld [vmem:[#allocation5 + $0x68] sm:$0xff]  ;;  %v409_v36 = vpack.c.bf16 %v164_v32, %v163_v31  ;;  %v165_v37 = vld [vmem:[#allocation7 + $0x50] sm:$0xff]  ;;  %p503_p0 = pnand %p502_p13, %p496_p10 }
  0x3f   :  { %378 = vmatprep.subr.bf16.mxu0 %v528_v0  ;;  %v166_v38 = vld [vmem:[#allocation7 + $0x58] sm:$0xff]  ;;  %v391_v39 = vpack.c.bf16 %v74_v35, %v73_v34  ;;  %v75_v40 = vld [vmem:[#allocation5 + $0x70] sm:$0xff]  ;;  %v167_v43 = vld [vmem:[#allocation7 + $0x60] sm:$0xff] }
  0x40   :  { %401 = vmatpush3.bf16.msra.mxu1 %v400_v18  ;;  %v76_v41 = vld [vmem:[#allocation5 + $0x78] sm:$0xff]  ;;  %v412_v42 = vpack.c.bf16 %v166_v38, %v165_v37  ;;  %v168_v44 = vld [vmem:[#allocation7 + $0x68] sm:$0xff]  ;;  %v169_v48 = vld [vmem:[#allocation7 + $0x70] sm:$0xff] }
  0x41   :  { %402 = vmatprep.subr.bf16.mxu1 %v528_v0  ;;  %v394_v45 = vpack.c.bf16 %v76_v41, %v75_v40  ;;  %v415_v46 = vpack.c.bf16 %v168_v44, %v167_v43  ;;  %v60_v47 = vld [vmem:[#allocation2] sm:$0xff] }
  0x42   :  { %380 = vmatpush3.bf16.msra.mxu0 %v379_v14  ;;  %v170_v49 = vld [vmem:[#allocation7 + $0x78] sm:$0xff] }
  0x43   :  { %381 = vmatprep.subr.bf16.mxu0 %v528_v0  ;;  %v418_v50 = vpack.c.bf16 %v170_v49, %v169_v48  ;;  %v266_v51 = vld [vmem:[%s640_s2] ss:$0 sm:$0xff] }
  0x44   :  { %404 = vmatpush3.bf16.msra.mxu1 %v403_v24  ;;  %v267_v56 = vld [vmem:[%s642_s4] ss:$0 sm:$0xff] }
  0x45   :  { %405 = vmatprep.subr.bf16.mxu1 %v528_v0 }
  0x46   :  { %383 = vmatpush3.bf16.msra.mxu0 %v382_v21 }
  0x47   :  { %384 = vmatprep.subr.bf16.mxu0 %v528_v0 }
  0x48   :  { %407 = vmatpush3.bf16.msra.mxu1 %v406_v30 }
  0x49   :  { %408 = vmatprep.subr.bf16.mxu1 %v528_v0 }
  0x4a   :  { %386 = vmatpush3.bf16.msra.mxu0 %v385_v27 }
  0x4b   :  { %387 = vmatprep.subr.bf16.mxu0 %v528_v0 }
  0x4c   :  { %410 = vmatpush3.bf16.msra.mxu1 %v409_v36 }
  0x4d   :  { %411 = vmatprep.subr.bf16.mxu1 %v528_v0 }
  0x4e   :  { %389 = vmatpush3.bf16.msra.mxu0 %v388_v33 }
  0x4f   :  { %390 = vmatprep.subr.bf16.mxu0 %v528_v0 }
  0x50   :  { %413 = vmatpush3.bf16.msra.mxu1 %v412_v42 }
  0x51   :  { %414 = vmatprep.subr.bf16.mxu1 %v528_v0 }
  0x52   :  { %392 = vmatpush3.bf16.msra.mxu0 %v391_v39 }
  0x53   :  { %393 = vmatprep.subr.bf16.mxu0 %v528_v0 }
  0x54   :  { %416 = vmatpush3.bf16.msra.mxu1 %v415_v46 }
  0x55   :  { %417 = vmatprep.subr.bf16.mxu1 %v528_v0 }
  0x56   :  { %395 = vmatpush3.bf16.msra.mxu0 %v394_v45 }
  0x58   :  { %419 = vmatpush3.bf16.msra.mxu1 %v418_v50 }
  0x59   :  { %335 = vmatmul.mubr.f32.vlgmr.msra.gmra.mrb[0].mxu0 %v60_v47 }
 0x12c   :  { %v150_v52 = vpop.f32.mrb[0].mxu0 }
 0x12d   :  { %v151_v53 = vadd.f32 %v266_v51, %v150_v52  ;;  %v336_v54 = vpop.f32.mrb[1].mxu0 }
 0x12f   :  { %v154_v55 = vmax.f32 %v151_v53, 0.0 }
 0x131   :  { %370 = vmatmul.mubr.f32.vlgmr.msra.gmra.mrb[0].mxu1 %v154_v55 }
 0x204   :  { %v244_v57 = vpop.f32.mrb[0].mxu1 }
 0x205   :  { %v245_v58 = vadd.f32 %v267_v56, %v244_v57  ;;  %v371_v59 = vpop.f32.mrb[1].mxu1 }
 0x207   :  { %v248_v60 = vmax.f32 %v245_v58, 0.0 }
 0x209   :  { %249 = vst [vmem:[#allocation8] sm:$0xff] %v248_v60 }
 0x20a   :  { %506 = shalt.err (!%p503_p0)
}
 0x20b   :  { %s507_s11 = scalar_lea.hbm %s643_s5, 128 }
 0x20c   :  { %p508_p1 = scmp.ne.s32.totalorder %s643_s5, %s507_s11  ;;  %p511_p2 = scmp.lt.u32.totalorder %s507_s11, %s643_s5 }
 0x20e   :  { %p513_p3 = pnand %p511_p2, %p508_p1 }
 0x210   :  { %516 = shalt.err (!%p513_p3)
}
 0x211   :  { %259 = dma.vmem_to_hbm [thread:$0]  %s257_s8, 128, %s643_s5, [#allocation4]  }
 0x212   :  { %521 = dma.done.wait [#allocation4], 128  }
 0x213   :  { %522 = vsyncadd [#allocation4], 4294967168 }
 0x214   :  { %263 = vsyncpa [#allocation3], 1 }
 0x215   :  { %264 = vsyncpa [#allocation6], 1 }
 0x216   :  { %265 = vsyncpa [#allocation4], 1 }

// kernel: tpu_custom_call.1
= control target key start
LH: loop header
LB: loop body
LE: loop exit
PB: predicated region body
PF: predicated region fallthrough
CT: control target
= control target key end

     0   :  { %8 = vsyncpa [#allocation4], 0  ;;  %s397_s0 = inlined_call_operand.hbm [shape: f32[8,128], index: 0, kind: input, shape index: {}]   ;;  %s398_s1 = inlined_call_operand.hbm [shape: f32[128,128], index: 1, kind: input, shape index: {}]   ;;  %s399_s2 = inlined_call_operand.vmem [shape: f32[1,128], index: 2, kind: input, shape index: {}]   ;;  %s400_s3 = inlined_call_operand.hbm [shape: f32[8,128], index: 3, kind: output, shape index: {}]  }
   0x1   :  { %9 = vsyncpa [#allocation7], 0 }
   0x2   :  { %10 = vsyncpa [#allocation5], 0  ;;  %s323_s12 = smov [#allocation3]   ;;  %s324_s14 = smov [#allocation6]  }
   0x3   :  { %s17_s13 = sshll.u32 %s323_s12, 4  ;;  %s26_s15 = sshll.u32 %s324_s14, 4  ;;  %s18_s13 = int_to_ptr.vmem [resolvable:$true] %s17_s13  ;;  %s351_s15 = int_to_ptr.vmem [resolvable:$true] %s26_s15 }
   0x4   :  { %s251_s18 = scalar_lea.hbm %s397_s0, 128 }
   0x5   :  { %p252_p0 = scmp.ne.s32.totalorder %s397_s0, %s251_s18  ;;  %p255_p1 = scmp.lt.u32.totalorder %s251_s18, %s397_s0 }
   0x7   :  { %p257_p2 = pnand %p255_p1, %p252_p0 }
   0x9   :  { %260 = shalt.err (!%p257_p2)
}
   0xa   :  { %s261_s23 = scalar_lea.vmem %s18_s13, 128  ;;  %p266_p4 = scmp.lt.s32.totalorder %s18_s13, %s18_s13 }
   0xb   :  { %p262_p3 = scmp.ne.s32.totalorder %s18_s13, %s261_s23  ;;  %p267_p5 = scmp.lt.s32.totalorder %s261_s23, %s261_s23 }
   0xd   :  { %p268_p6 = por %p267_p5, %p266_p4 }
   0xf   :  { %p269_p7 = pnand %p268_p6, %p262_p3 }
  0x11   :  { %272 = shalt.err (!%p269_p7)
}
  0x12   :  { %20 = dma.hbm_to_vmem [thread:$0]  %s397_s0, 128, %s18_s13, [#allocation4]  }
  0x13   :  { %s273_s28 = scalar_lea.hbm %s398_s1, 2048 }
  0x14   :  { %p274_p8 = scmp.ne.s32.totalorder %s398_s1, %s273_s28  ;;  %p277_p9 = scmp.lt.u32.totalorder %s273_s28, %s398_s1 }
  0x16   :  { %p279_p10 = pnand %p277_p9, %p274_p8 }
  0x18   :  { %282 = shalt.err (!%p279_p10)
}
  0x19   :  { %s283_s6 = scalar_lea.vmem %s351_s15, 2048  ;;  %p288_p12 = scmp.lt.s32.totalorder %s351_s15, %s351_s15 }
  0x1a   :  { %p284_p11 = scmp.ne.s32.totalorder %s351_s15, %s283_s6  ;;  %p289_p13 = scmp.lt.s32.totalorder %s283_s6, %s283_s6 }
  0x1c   :  { %p290_p0 = por %p289_p13, %p288_p12 }
  0x1e   :  { %p291_p1 = pnand %p290_p0, %p284_p11 }
  0x20   :  { %294 = shalt.err (!%p291_p1)
}
  0x21   :  { %s325_s0 = smov 128   ;;  %s326_s7 = smov 8  }
  0x22   :  { %32 = dma.hbm_to_vmem [thread:$0]  %s398_s1, 2048, %s351_s15, [#allocation7], %s325_s0, %s325_s0, %s326_s7  }
  0x23   :  { %317 = dma.done.wait [#allocation4], 128  }
  0x24   :  { %318 = vsyncadd [#allocation4], 4294967168 }
  0x25   :  { %319 = dma.done.wait [#allocation7], 2048  }
  0x26   :  { %320 = vsyncadd [#allocation7], 4294965248  ;;  %v327_v0 = vmov 0.0|0.0   ;;  %vm328_vm0 = vmmov 0   ;;  %v329_v1 = vmov 0.0   ;;  %v48_v2 = vld [vmem:[#allocation6] sm:$0xff] }
  0x27   :  { %219 = vmatprep.subr.bf16.mxu0 %v327_v0  ;;  %216 = vmatprep.mubr.msk.f32.mxu0 %vm328_vm0, %v329_v1  ;;  %v49_v3 = vld [vmem:[#allocation6 + $0x8] sm:$0xff]  ;;  %v50_v4 = vld [vmem:[#allocation6 + $0x10] sm:$0xff]  ;;  %v51_v6 = vld [vmem:[#allocation6 + $0x18] sm:$0xff]  ;;  %s330_s11 = smov [#allocation8]  }
  0x28   :  { %v220_v5 = vpack.c.bf16 %v49_v3, %v48_v2  ;;  %v223_v7 = vpack.c.bf16 %v51_v6, %v50_v4  ;;  %v52_v8 = vld [vmem:[#allocation6 + $0x20] sm:$0xff]  ;;  %v53_v9 = vld [vmem:[#allocation6 + $0x28] sm:$0xff]  ;;  %v54_v11 = vld [vmem:[#allocation6 + $0x30] sm:$0xff]  ;;  %s156_s12 = sshll.u32 %s330_s11, 4  ;;  %s157_s12 = int_to_ptr.vmem [resolvable:$true] %s156_s12 }
  0x29   :  { %v226_v10 = vpack.c.bf16 %v53_v9, %v52_v8  ;;  %v55_v12 = vld [vmem:[#allocation6 + $0x38] sm:$0xff]  ;;  %v56_v14 = vld [vmem:[#allocation6 + $0x40] sm:$0xff]  ;;  %v57_v15 = vld [vmem:[#allocation6 + $0x48] sm:$0xff]  ;;  %s295_s13 = scalar_lea.vmem %s157_s12, 128  ;;  %p300_p3 = scmp.lt.s32.totalorder %s157_s12, %s157_s12 }
  0x2a   :  { %221 = vmatpush3.bf16.msra.mxu0 %v220_v5  ;;  %v229_v13 = vpack.c.bf16 %v55_v12, %v54_v11  ;;  %v232_v16 = vpack.c.bf16 %v57_v15, %v56_v14  ;;  %v58_v17 = vld [vmem:[#allocation6 + $0x50] sm:$0xff]  ;;  %v59_v18 = vld [vmem:[#allocation6 + $0x58] sm:$0xff]  ;;  %v60_v20 = vld [vmem:[#allocation6 + $0x60] sm:$0xff]  ;;  %p296_p2 = scmp.ne.s32.totalorder %s157_s12, %s295_s13  ;;  %p301_p4 = scmp.lt.s32.totalorder %s295_s13, %s295_s13 }
  0x2b   :  { %222 = vmatprep.subr.bf16.mxu0 %v327_v0  ;;  %v235_v19 = vpack.c.bf16 %v59_v18, %v58_v17  ;;  %v61_v21 = vld [vmem:[#allocation6 + $0x68] sm:$0xff]  ;;  %v62_v23 = vld [vmem:[#allocation6 + $0x70] sm:$0xff]  ;;  %v63_v24 = vld [vmem:[#allocation6 + $0x78] sm:$0xff] }
  0x2c   :  { %v238_v22 = vpack.c.bf16 %v61_v21, %v60_v20  ;;  %v241_v25 = vpack.c.bf16 %v63_v24, %v62_v23  ;;  %v47_v26 = vld [vmem:[#allocation3] sm:$0xff]  ;;  %p302_p5 = por %p301_p4, %p300_p3 }
  0x2d   :  { %v166_v27 = vld [vmem:[%s399_s2] ss:$0 sm:$0xff] }
  0x2e   :  { %224 = vmatpush3.bf16.msra.mxu0 %v223_v7  ;;  %p303_p6 = pnand %p302_p5, %p296_p2 }
  0x2f   :  { %225 = vmatprep.subr.bf16.mxu0 %v327_v0 }
  0x32   :  { %227 = vmatpush3.bf16.msra.mxu0 %v226_v10 }
  0x33   :  { %228 = vmatprep.subr.bf16.mxu0 %v327_v0 }
  0x36   :  { %230 = vmatpush3.bf16.msra.mxu0 %v229_v13 }
  0x37   :  { %231 = vmatprep.subr.bf16.mxu0 %v327_v0 }
  0x3a   :  { %233 = vmatpush3.bf16.msra.mxu0 %v232_v16 }
  0x3b   :  { %234 = vmatprep.subr.bf16.mxu0 %v327_v0 }
  0x3e   :  { %236 = vmatpush3.bf16.msra.mxu0 %v235_v19 }
  0x3f   :  { %237 = vmatprep.subr.bf16.mxu0 %v327_v0 }
  0x42   :  { %239 = vmatpush3.bf16.msra.mxu0 %v238_v22 }
  0x43   :  { %240 = vmatprep.subr.bf16.mxu0 %v327_v0 }
  0x46   :  { %242 = vmatpush3.bf16.msra.mxu0 %v241_v25 }
  0x49   :  { %217 = vmatmul.mubr.f32.vlgmr.msra.gmra.mrb[0].mxu0 %v47_v26 }
 0x11c   :  { %v130_v28 = vpop.f32.mrb[0].mxu0 }
 0x11d   :  { %v147_v29 = vadd.f32 %v166_v27, %v130_v28  ;;  %v218_v30 = vpop.f32.mrb[1].mxu0 }
 0x11f   :  { %v148_v31 = vmax.f32 %v147_v29, 0.0 }
 0x121   :  { %149 = vst [vmem:[#allocation8] sm:$0xff] %v148_v31 }
 0x122   :  { %306 = shalt.err (!%p303_p6)
}
 0x123   :  { %s307_s16 = scalar_lea.hbm %s400_s3, 128 }
 0x124   :  { %p308_p7 = scmp.ne.s32.totalorder %s400_s3, %s307_s16  ;;  %p311_p8 = scmp.lt.u32.totalorder %s307_s16, %s400_s3 }
 0x126   :  { %p313_p9 = pnand %p311_p8, %p308_p7 }
 0x128   :  { %316 = shalt.err (!%p313_p9)
}
 0x129   :  { %159 = dma.vmem_to_hbm [thread:$0]  %s157_s12, 128, %s400_s3, [#allocation5]  }
 0x12a   :  { %321 = dma.done.wait [#allocation5], 128  }
 0x12b   :  { %322 = vsyncadd [#allocation5], 4294967168 }
 0x12c   :  { %163 = vsyncpa [#allocation4], 1 }
 0x12d   :  { %164 = vsyncpa [#allocation7], 1 }
 0x12e   :  { %165 = vsyncpa [#allocation5], 1 }

</bundles_post_ra>
